<compile_context>
chip_gen: v7x
topology: tpu7x:2x2x1
jax: 0.10.0
libtpu: 0.0.40
codegen_flags: <defaults>
</compile_context>

<pallas_src>
import jax
import jax.numpy as jnp
from jax.experimental import pallas as pl
from jax.experimental.pallas import tpu as pltpu


def param_agg_kernel(x_ref, w1_ref, b1_ref, w2_ref, b2_ref, w3_ref, b3_ref,
                     o_ref):
    # x_ref: (C_in, TILE_HW) — pixels on the 128-lane axis.
    x = x_ref[...]
    h = jnp.dot(w1_ref[...], x, preferred_element_type=jnp.float32)
    h = jnp.maximum(h + b1_ref[...], 0.0)                    # ReLU
    h = jnp.dot(w2_ref[...], h, preferred_element_type=jnp.float32)
    h = jnp.maximum(h + b2_ref[...], 0.0)                    # ReLU
    h = jnp.dot(w3_ref[...], h, preferred_element_type=jnp.float32)
    o_ref[...] = (h + b3_ref[...]).astype(o_ref.dtype)


def _round_up(x, m):
    return (x + m - 1) // m * m


def param_agg_forward(x_nchw, params, *, tile_hw=8192):
    """x_nchw: [N, C_in, H, W] float32.  params: (c_out, c_in) weights, (c_out, 1) biases."""
    n, c_in, h, w = x_nchw.shape
    w1, b1, w2, b2, w3, b3 = (params["w1"], params["b1"], params["w2"],
                              params["b2"], params["w3"], params["b3"])
    c_out = w3.shape[0]

    hw = h * w
    # Channels on sublanes, pixels on lanes: a free view of NCHW.
    x3d = x_nchw.reshape(n, c_in, hw)

    # Lane tile: multiple of 128, no larger than (padded) H*W.
    hw_pad = _round_up(hw, 128)
    t = _round_up(min(tile_hw, hw_pad), 128)
    hw_pad = _round_up(hw_pad, t)
    if hw_pad != hw:
        x3d = jnp.pad(x3d, ((0, 0), (0, 0), (0, hw_pad - hw)))

    grid = (n, hw_pad // t)

    # Small weights/biases live whole in VMEM (no per-step double-buffer DMA).
    vmem_spec = pl.BlockSpec(memory_space=pltpu.MemorySpace.VMEM)

    out3d = pl.pallas_call(
        param_agg_kernel,
        out_shape=jax.ShapeDtypeStruct((n, c_out, hw_pad), jnp.float32),
        grid_spec=pltpu.PrefetchScalarGridSpec(
            num_scalar_prefetch=0,
            grid=grid,
            in_specs=[
                pl.BlockSpec((None, c_in, t), lambda b, j: (b, 0, j)),
                vmem_spec,  # w1
                vmem_spec,  # b1
                vmem_spec,  # w2
                vmem_spec,  # b2
                vmem_spec,  # w3
                vmem_spec,  # b3
            ],
            out_specs=pl.BlockSpec((None, c_out, t), lambda b, j: (b, 0, j)),
        ),
        compiler_params=pltpu.CompilerParams(
            dimension_semantics=("parallel", "parallel")),
    )(x3d, w1, b1, w2, b2, w3, b3)

    if hw_pad != hw:
        out3d = out3d[:, :, :hw]
    return out3d.reshape(n, c_out, h, w)


def init_params(key, Mk, M):
    """Deterministic init matching ParamAgg(Mk, M) layer shapes.

    Torch Conv2d(c_in, c_out, k=1) weight is (c_out, c_in, 1, 1); we store the
    equivalent matmul weight as (c_out, c_in) and bias as (c_out, 1).
    """
    i = 4 * Mk + 2 * M
    o = 2 * Mk
    s = (i - o) // 3
    dims = [(i, i - s), (i - s, o + s), (o + s, o)]
    params = {}
    for idx, (ci, co) in enumerate(dims, start=1):
        key, kw, kb = jax.random.split(key, 3)
        bound = 1.0 / (ci ** 0.5)  # matches torch Conv2d default uniform bound
        params[f"w{idx}"] = jax.random.uniform(
            kw, (co, ci), jnp.float32, -bound, bound)
        params[f"b{idx}"] = jax.random.uniform(
            kb, (co, 1), jnp.float32, -bound, bound)
    return params


def reference_forward(x_nchw, params):
    """Plain-JAX reference of the same forward (for sanity check)."""
    n, c, h, w = x_nchw.shape
    x = x_nchw.reshape(n, c, h * w)
    y = jnp.maximum(
        jnp.einsum("oc,ncp->nop", params["w1"], x) + params["b1"][None], 0.0)
    y = jnp.maximum(
        jnp.einsum("oc,ncp->nop", params["w2"], y) + params["b2"][None], 0.0)
    y = jnp.einsum("oc,ncp->nop", params["w3"], y) + params["b3"][None]
    co = y.shape[1]
    return y.reshape(n, co, h, w)


if __name__ == "__main__":
    Mk, M = 4, 2                 # i = 20, o = 8, s = 4  -> 20 -> 16 -> 12 -> 8
    N, H, W = 2, 16, 16
    c_in = 4 * Mk + 2 * M

    key = jax.random.PRNGKey(0)
    key, kx = jax.random.split(key)
    x = jax.random.normal(kx, (N, c_in, H, W), jnp.float32)

    params = init_params(key, Mk, M)

    out = param_agg_forward(x, params)
    out = jax.block_until_ready(out)

    ref = reference_forward(x, params)
    assert out.shape == (N, 2 * Mk, H, W)
    assert jnp.allclose(out, ref, atol=1e-4, rtol=1e-4)

    print("KERNEL_OK")
</pallas_src>

<mosaic_0001>
module attributes {stable_mosaic.version = 11 : i64} {
  func.func @param_agg_kernel(%arg0: i32, %arg1: i32, %arg2: memref<1x20x256xf32, #tpu.memory_space<vmem>>, %arg3: memref<16x20xf32, #tpu.memory_space<vmem>>, %arg4: memref<16x1xf32, #tpu.memory_space<vmem>>, %arg5: memref<12x16xf32, #tpu.memory_space<vmem>>, %arg6: memref<12x1xf32, #tpu.memory_space<vmem>>, %arg7: memref<8x12xf32, #tpu.memory_space<vmem>>, %arg8: memref<8x1xf32, #tpu.memory_space<vmem>>, %arg9: memref<1x8x256xf32, #tpu.memory_space<vmem>>) attributes {dimension_semantics = [#tpu.dimension_semantics<parallel>, #tpu.dimension_semantics<parallel>], iteration_bounds = array<i64: 2, 1>, scalar_prefetch = 0 : i64, scratch_operands = 0 : i64, tpu.core_type = #tpu.core_type<tc>, window_params = [{transform_indices = @transform_0, window_bounds = array<i64: 1, 20, 256>}, {pipeline_mode = #tpu.pipeline_mode<synchronous>, transform_indices = @transform_1, window_bounds = array<i64: 16, 20>}, {pipeline_mode = #tpu.pipeline_mode<synchronous>, transform_indices = @transform_2, window_bounds = array<i64: 16, 1>}, {pipeline_mode = #tpu.pipeline_mode<synchronous>, transform_indices = @transform_3, window_bounds = array<i64: 12, 16>}, {pipeline_mode = #tpu.pipeline_mode<synchronous>, transform_indices = @transform_4, window_bounds = array<i64: 12, 1>}, {pipeline_mode = #tpu.pipeline_mode<synchronous>, transform_indices = @transform_5, window_bounds = array<i64: 8, 12>}, {pipeline_mode = #tpu.pipeline_mode<synchronous>, transform_indices = @transform_6, window_bounds = array<i64: 8, 1>}, {transform_indices = @transform_7, window_bounds = array<i64: 1, 8, 256>}]} {
    %c0 = arith.constant 0 : index
    %c0_0 = arith.constant 0 : index
    %c0_1 = arith.constant 0 : index
    %0 = vector.load %arg2[%c0, %c0_0, %c0_1] : memref<1x20x256xf32, #tpu.memory_space<vmem>>, vector<1x20x256xf32>
    %1 = vector.shape_cast %0 : vector<1x20x256xf32> to vector<20x256xf32>
    %c0_2 = arith.constant 0 : index
    %c0_3 = arith.constant 0 : index
    %2 = vector.load %arg3[%c0_2, %c0_3] : memref<16x20xf32, #tpu.memory_space<vmem>>, vector<16x20xf32>
    %cst = arith.constant dense<0.000000e+00> : vector<16x256xf32>
    %3 = tpu.matmul %2, %1, %cst {dimension_numbers = #tpu.dot_dimension_numbers<[1], [0], [0], [1], [0, 0, 1, 1], [], []>} : vector<16x20xf32>, vector<20x256xf32>, vector<16x256xf32> -> vector<16x256xf32>
    %c0_4 = arith.constant 0 : index
    %c0_5 = arith.constant 0 : index
    %4 = vector.load %arg4[%c0_4, %c0_5] : memref<16x1xf32, #tpu.memory_space<vmem>>, vector<16x1xf32>
    %5 = vector.broadcast %4 : vector<16x1xf32> to vector<16x256xf32>
    %6 = arith.addf %3, %5 : vector<16x256xf32>
    %cst_6 = arith.constant 0.000000e+00 : f32
    %7 = vector.broadcast %cst_6 : f32 to vector<16x256xf32>
    %8 = arith.maximumf %6, %7 : vector<16x256xf32>
    %c0_7 = arith.constant 0 : index
    %c0_8 = arith.constant 0 : index
    %9 = vector.load %arg5[%c0_7, %c0_8] : memref<12x16xf32, #tpu.memory_space<vmem>>, vector<12x16xf32>
    %cst_9 = arith.constant dense<0.000000e+00> : vector<12x256xf32>
    %10 = tpu.matmul %9, %8, %cst_9 {dimension_numbers = #tpu.dot_dimension_numbers<[1], [0], [0], [1], [0, 0, 1, 1], [], []>} : vector<12x16xf32>, vector<16x256xf32>, vector<12x256xf32> -> vector<12x256xf32>
    %c0_10 = arith.constant 0 : index
    %c0_11 = arith.constant 0 : index
    %11 = vector.load %arg6[%c0_10, %c0_11] : memref<12x1xf32, #tpu.memory_space<vmem>>, vector<12x1xf32>
    %12 = vector.broadcast %11 : vector<12x1xf32> to vector<12x256xf32>
    %13 = arith.addf %10, %12 : vector<12x256xf32>
    %cst_12 = arith.constant 0.000000e+00 : f32
    %14 = vector.broadcast %cst_12 : f32 to vector<12x256xf32>
    %15 = arith.maximumf %13, %14 : vector<12x256xf32>
    %c0_13 = arith.constant 0 : index
    %c0_14 = arith.constant 0 : index
    %16 = vector.load %arg7[%c0_13, %c0_14] : memref<8x12xf32, #tpu.memory_space<vmem>>, vector<8x12xf32>
    %cst_15 = arith.constant dense<0.000000e+00> : vector<8x256xf32>
    %17 = tpu.matmul %16, %15, %cst_15 {dimension_numbers = #tpu.dot_dimension_numbers<[1], [0], [0], [1], [0, 0, 1, 1], [], []>} : vector<8x12xf32>, vector<12x256xf32>, vector<8x256xf32> -> vector<8x256xf32>
    %c0_16 = arith.constant 0 : index
    %c0_17 = arith.constant 0 : index
    %18 = vector.load %arg8[%c0_16, %c0_17] : memref<8x1xf32, #tpu.memory_space<vmem>>, vector<8x1xf32>
    %19 = vector.broadcast %18 : vector<8x1xf32> to vector<8x256xf32>
    %20 = arith.addf %17, %19 : vector<8x256xf32>
    %c0_18 = arith.constant 0 : index
    %c0_19 = arith.constant 0 : index
    %c0_20 = arith.constant 0 : index
    %21 = vector.load %arg9[%c0_18, %c0_19, %c0_20] : memref<1x8x256xf32, #tpu.memory_space<vmem>>, vector<1x8x256xf32>
    %22 = vector.shape_cast %21 : vector<1x8x256xf32> to vector<8x256xf32>
    %23 = vector.shape_cast %20 : vector<8x256xf32> to vector<1x8x256xf32>
    tpu.vector_store %arg9[%c0_18, %c0_19, %c0_20], %23 {strides = array<i32>} : memref<1x8x256xf32, #tpu.memory_space<vmem>>, vector<1x8x256xf32>,
    return
  }
  func.func @transform_0(%arg0: i32, %arg1: i32) -> (i32, i32, i32) {
    %c0_i32 = arith.constant 0 : i32
    %c0_i32_0 = arith.constant 0 : i32
    return %arg0, %c0_i32, %arg1 : i32, i32, i32
  }
  func.func @transform_1(%arg0: i32, %arg1: i32) -> (i32, i32) {
    %c0_i32 = arith.constant 0 : i32
    %c0_i32_0 = arith.constant 0 : i32
    %c0_i32_1 = arith.constant 0 : i32
    return %c0_i32, %c0_i32_0 : i32, i32
  }
  func.func @transform_2(%arg0: i32, %arg1: i32) -> (i32, i32) {
    %c0_i32 = arith.constant 0 : i32
    %c0_i32_0 = arith.constant 0 : i32
    %c0_i32_1 = arith.constant 0 : i32
    return %c0_i32, %c0_i32_0 : i32, i32
  }
  func.func @transform_3(%arg0: i32, %arg1: i32) -> (i32, i32) {
    %c0_i32 = arith.constant 0 : i32
    %c0_i32_0 = arith.constant 0 : i32
    %c0_i32_1 = arith.constant 0 : i32
    return %c0_i32, %c0_i32_0 : i32, i32
  }
  func.func @transform_4(%arg0: i32, %arg1: i32) -> (i32, i32) {
    %c0_i32 = arith.constant 0 : i32
    %c0_i32_0 = arith.constant 0 : i32
    %c0_i32_1 = arith.constant 0 : i32
    return %c0_i32, %c0_i32_0 : i32, i32
  }
  func.func @transform_5(%arg0: i32, %arg1: i32) -> (i32, i32) {
    %c0_i32 = arith.constant 0 : i32
    %c0_i32_0 = arith.constant 0 : i32
    %c0_i32_1 = arith.constant 0 : i32
    return %c0_i32, %c0_i32_0 : i32, i32
  }
  func.func @transform_6(%arg0: i32, %arg1: i32) -> (i32, i32) {
    %c0_i32 = arith.constant 0 : i32
    %c0_i32_0 = arith.constant 0 : i32
    %c0_i32_1 = arith.constant 0 : i32
    return %c0_i32, %c0_i32_0 : i32, i32
  }
  func.func @transform_7(%arg0: i32, %arg1: i32) -> (i32, i32, i32) {
    %c0_i32 = arith.constant 0 : i32
    %c0_i32_0 = arith.constant 0 : i32
    return %arg0, %c0_i32, %arg1 : i32, i32, i32
  }
}

</mosaic_0001>

<bundles_post_ra>
// kernel: tpu_custom_call.1
= control target key start
LH: loop header
LB: loop body
LE: loop exit
PB: predicated region body
PF: predicated region fallthrough
CT: control target
= control target key end

     0   :  { %12 = vsyncpa [#allocation3], 0  ;;  %s1074_s0 = inlined_call_operand.vmem [shape: f32[2,20,256], index: 0, kind: input, shape index: {}]   ;;  %s1075_s1 = inlined_call_operand.vmem [shape: f32[16,20], index: 1, kind: input, shape index: {}]   ;;  %s1076_s2 = inlined_call_operand.vmem [shape: f32[16,1], index: 2, kind: input, shape index: {}]   ;;  %s1077_s3 = inlined_call_operand.vmem [shape: f32[12,16], index: 3, kind: input, shape index: {}]   ;;  %s1078_s4 = inlined_call_operand.vmem [shape: f32[12,1], index: 4, kind: input, shape index: {}]   ;;  %s1079_s5 = inlined_call_operand.vmem [shape: f32[8,12], index: 5, kind: input, shape index: {}]   ;;  %s1080_s6 = inlined_call_operand.vmem [shape: f32[8,1], index: 6, kind: input, shape index: {}]   ;;  %s1081_s7 = inlined_call_operand.hbm [shape: f32[2,8,256], index: 7, kind: output, shape index: {}]  }
   0x1   :  { %14 = vsyncpa [#allocation3 + $0x1], 0  ;;  %s929_s24 = smov 0   ;;  %s931_s25 = smov 0  }
   0x2   :  { %s933_s26 = smov 0   ;;  %s935_s27 = smov 0  }
   0x3   :  { %s937_s28 = smov 0   ;;  %s939_s29 = smov 0  }
   0x4 LB: > { %s708_s30 = sadd.s32 4294967295, %s883_s29   ;;  %s709_s8 = sadd.s32 4294967294, %s883_s29   ;;  %s883_s29 = sphi %s939_s29, %s20_s29   ;;  %s879_s28 = sphi %s937_s28, %s1088_s28   ;;  %s875_s27 = sphi %s935_s27, %s1087_s27   ;;  %s871_s26 = sphi %s933_s26, %s1086_s26   ;;  %s867_s25 = sphi %s931_s25, %s1085_s25   ;;  %s863_s24 = sphi %s929_s24, %s1084_s24  }
   0x5   : > { %s32_s9 = sadd.s32 1, %s879_s28  ;;  %s195_s10 = sadd.s32 1, %s871_s26 }
   0x6   : > { %p34_p0 = scmp.ge.s32.totalorder %s32_s9, 2  ;;  %p205_p1 = scmp.ne.s32.totalorder %s871_s26, %s867_s25 }
   0x7   : > { %p206_p2 = scmp.eq.s32.totalorder %s708_s30, 1  ;;  %p211_p3 = scmp.ne.s32.totalorder %s867_s25, %s863_s24 }
   0x8   : > { %s1090_s9 = smov (%p34_p0, %s32_s9), 0  ;;  %p212_p5 = scmp.eq.s32.totalorder %s709_s8, 1 }
   0x9   : > { %p969_p4 = por %p206_p2, %p205_p1  ;;  %s190_s12 = ssub.s32 %s879_s28, %s1090_s9 }
   0xa   : > { %p712_p6 = scmp.ge.s32.totalorder %s883_s29, 1  ;;  %p193_p7 = scmp.eq.s32.totalorder %s190_s12, 0 }
   0xb   : > { %p976_p8 = por %p212_p5, %p211_p3  ;;  %p261_p9 = scmp.lt.s32.totalorder %s883_s29, 3 }
   0xc   : > { %s982_s14 = scalar_select %p193_p7, %s871_s26, %s195_s10  }
   0xd   : > { %p262_p10 = pnand %p712_p6, %p261_p9 }
   0xe   : > { %p298_p11 = scmp.lt.s32.totalorder (!%p262_p10), %s875_s27, 1  ;;  %v885_v0 = vmov (!%p262_p10), 0.0   ;;  %v316_v1 = vld [vmem:[%s1076_s2] sm:$0xff] (!%p262_p10)  ;;  %v886_v2 = vmov (!%p262_p10), 0   ;;  %v317_v3 = vld [vmem:[%s1076_s2 + $0x8] sm:$0xff] (!%p262_p10)  ;;  %vm335_vm0 = vcmask (!%p262_p10), 1043456  }
   0xf   : > { %265 = sbr.rel (%p262_p10) target bundleno = 719 (0x2cf), region = 48  ;;  %406 = vmatprep.mubr.f32.mxu0 (!%p262_p10), %v885_v0  ;;  %508 = vmatprep.mubr.f32.mxu1 (!%p262_p10), %v885_v0  ;;  %v526_v9 = vld [vmem:[%s1080_s6] sm:$0xff] (!%p262_p10)  ;;  %vm328_vm1 = vcmask (!%p262_p10), 162816   ;;  %v315_v14 = vld [vmem:[%s1075_s1 + $0x8] sm:$0xff] (!%p262_p10)  ;;  %vm437_vm2 = vcmask (!%p262_p10), 130048   ;;  %vm887_vm3 = vmmov (!%p262_p10), 1  }
  0x10   : > { %803 = vset.pattern.permute.xlu0 (!%p262_p10), %v886_v2  ;;  %804 = vset.pattern.permute.xlu1 (!%p262_p10), %v886_v2  ;;  %v314_v13 = vld [vmem:[%s1075_s1] sm:$0xff] (!%p262_p10)  ;;  %v426_v16 = vld [vmem:[%s1078_s4 + $0x8] sm:$0xf] (!%p262_p10)  ;;  %vm739_vm4 = vmpackc.low (!%p262_p10), %vm335_vm0, %vm887_vm3  ;;  %vm532_vm5 = vcmask (!%p262_p10), 97280   ;;  %s294_s12 = sand.u32 (!%p262_p10), 1, %s867_s25   ;;  %s729_s16 = sshll.u32 (!%p262_p10), %s875_s27, 8 }
  0x11   : > { %320 = vperm.xlu0 (!%p262_p10), %803, %v316_v1   ;;  %v425_v15 = vld [vmem:[%s1078_s4] sm:$0xff] (!%p262_p10)  ;;  %v424_v34 = vld [vmem:[%s1077_s3 + $0x8] sm:$0xf] (!%p262_p10)  ;;  %s713_s15 = sshll.u32 (!%p262_p10), %s294_s12, 4  ;;  %s1027_s21 = scalar_lea.hbm (!%p262_p10), %s1081_s7, %s729_s16 }
  0x12   : > { %429 = vperm.xlu1 (!%p262_p10), %804, %v425_v15   ;;  %v423_v33 = vld [vmem:[%s1077_s3] sm:$0xff] (!%p262_p10) }
  0x13   : > { %v525_v51 = vld [vmem:[%s1079_s5] sm:$0xff] (!%p262_p10) }
  0x15   : > { %325 = vperm.xlu0 (!%p262_p10), %803, %v317_v3  }
  0x16   : > { %s299_s17 = scalar_select %p298_p11, %s875_s27, 1  ;;  %434 = vperm.xlu1 %804, %v426_v16  }
  0x17   : > { %s616_s27 = scalar_lea.sflag [#allocation3], %s294_s12 }
  0x18   : > { %s744_s18 = smul.u32 48, %s299_s17  ;;  %s296_s17 = scalar_lea.vmem [#allocation2], %s713_s15 }
  0x19   : > { %529 = vperm.xlu0 %803, %v526_v9  }
  0x1a   : > { %s305_s23 = scalar_lea.vmem %s1074_s0, %s744_s18  ;;  %s632_s18 = sshll.u32 %s296_s17, 4  ;;  %s1029_s18 = int_to_ptr.vmem [resolvable:$true] %s632_s18 }
  0x1b   : > { %v309_v4 = vld [vmem:[%s305_s23 + $0x8] sm:$0xff]  ;;  %v311_v5 = vld [vmem:[%s305_s23 + $0x18] sm:$0xff]  ;;  %v308_v6 = vld [vmem:[%s305_s23] sm:$0xff]  ;;  %s805_s22 = scalar_lea.vmem %s1029_s18, 256 }
  0x1c   : > { %v730_v7 = vpack.c.bf16 %v311_v5, %v309_v4  ;;  %v310_v8 = vld [vmem:[%s305_s23 + $0x10] sm:$0xff]  ;;  %v313_v11 = vld [vmem:[%s305_s23 + $0x28] sm:$0xf]  ;;  %v312_v12 = vld [vmem:[%s305_s23 + $0x20] sm:$0xf]  ;;  %p806_p12 = scmp.ne.s32.totalorder %s1029_s18, %s805_s22  ;;  %s888_s23 = smov [#allocation2]  }
  0x1d   : > { %v732_v10 = vpack.c.bf16 %v310_v8, %v308_v6  ;;  %s809_s30 = sshll.u32 %s888_s23, 4  ;;  %s810_s30 = int_to_ptr.vmem [resolvable:$false] %s809_s30 }
  0x1e   : > { %731 = vmatprep.subr.bf16.mxu0 %v730_v7  ;;  %p807_p13 = pnand %p806_p12, %p969_p4  ;;  %s811_s8 = scalar_lea.vmem %s810_s30, 512 }
  0x1f   : > { %733 = vmatpush1.bf16.msra.mxu0 %v732_v10  ;;  %p812_p1 = scmp.lt.s32.totalorder %s1029_s18, %s810_s30  ;;  %p813_p2 = scmp.lt.s32.totalorder %s811_s8, %s805_s22 }
  0x20   : > { %715 = vmatprep.subr.msk.mxu0 %vm335_vm0, %v313_v11  ;;  %p808_p0 = pneg %p807_p13 }
  0x21   : > { %p814_p3 = por %p813_p2, %p812_p1 }
  0x23   : > { %716 = vmatpush1.msk.msra.mxu0 %vm335_vm0, %v312_v12  ;;  %p815_p5 = pnand %p814_p3, %p808_p0 }
  0x24   : > { %717 = vmatmul.mubr.msk.f32.vlgmr.msra.gmra.mrb[0].mxu0 %vm328_vm1, %v314_v13 }
  0x25   : > { %412 = vmatprep.mubr.f32.mxu0 %v885_v0 }
  0x28   : > { %718 = vmatmul.mubr.msk.f32.gmra.mrb[2].mxu0 %vm328_vm1, %v315_v14 }
  0x90   : > { %v321_v17 = vpop.permute.xlu0 %320 }
  0x91   : > { %v430_v35 = vpop.permute.xlu1 %429 }
  0x94   : > { %v326_v21 = vpop.permute.xlu0 %325 }
  0x95   : > { %v435_v39 = vpop.permute.xlu1 %434 }
  0x98   : > { %v530_v52 = vpop.permute.xlu0 %529 }
  0xf7   : > { %v408_v18 = vpop.f32.mrb[0].mxu0 }
  0xf8   : > { %v410_v19 = vpop.f32.mrb[1].mxu0  ;;  %v409_v20 = vadd.f32 %v408_v18, %v321_v17 }
  0xf9   : > { %v411_v22 = vadd.f32 %v410_v19, %v321_v17 }
  0xfa   : > { %v419_v27 = vmax.f32 %v409_v20, 0.0 }
  0xfb   : > { %v414_v23 = vpop.f32.mrb[2].mxu0  ;;  %v420_v29 = vmax.f32 %v411_v22, 0.0 }
  0xfc   : > { %v415_v24 = vadd.f32 %v414_v23, %v326_v21  ;;  %v416_v25 = vpop.f32.mrb[3].mxu0 }
  0xfd   : > { %v417_v26 = vadd.f32 %v416_v25, %v326_v21 }
  0xfe   : > { %v421_v28 = vmax.f32 %v415_v24, 0.0 }
  0xff   : > { %v422_v30 = vmax.f32 %v417_v26, 0.0 }
 0x100   : > { %v736_v31 = vpack.c.bf16 %v421_v28, %v419_v27 }
 0x101   : > { %v734_v32 = vpack.c.bf16 %v422_v30, %v420_v29 }
 0x103   : > { %735 = vmatprep.subr.bf16.mxu1 %v734_v32 }
 0x104   : > { %737 = vmatpush1.bf16.msra.mxu1 %v736_v31 }
 0x107   : > { %719 = vmatmul.mubr.msk.f32.vlgmr.msra.gmra.mrb[0].mxu1 %vm437_vm2, %v423_v33 }
 0x108   : > { %514 = vmatprep.mubr.f32.mxu1 %v885_v0 }
 0x10b   : > { %720 = vmatmul.mubr.msk.f32.gmra.mrb[2].mxu1 %vm437_vm2, %v424_v34 }
 0x10c   : > { %606 = vmatprep.mubr.f32.mxu1 %v885_v0 }
 0x1da   : > { %v510_v36 = vpop.f32.mrb[0].mxu1 }
 0x1db   : > { %v512_v37 = vpop.f32.mrb[1].mxu1  ;;  %v511_v38 = vadd.f32 %v510_v36, %v430_v35 }
 0x1dc   : > { %v513_v40 = vadd.f32 %v512_v37, %v430_v35 }
 0x1dd   : > { %v521_v45 = vmax.f32 %v511_v38, 0.0 }
 0x1de   : > { %v516_v41 = vpop.f32.mrb[2].mxu1  ;;  %v522_v47 = vmax.f32 %v513_v40, 0.0 }
 0x1df   : > { %v517_v42 = vadd.f32 %v516_v41, %v435_v39  ;;  %v518_v43 = vpop.f32.mrb[3].mxu1 }
 0x1e0   : > { %v519_v44 = vadd.f32 %v518_v43, %v435_v39 }
 0x1e1   : > { %v523_v46 = vmax.f32 %v517_v42, 0.0 }
 0x1e2   : > { %v524_v48 = vmax.f32 %v519_v44, 0.0 }
 0x1e3   : > { %v741_v49 = vpack.c.bf16 %v523_v46, %v521_v45 }
 0x1e4   : > { %v738_v50 = vpack.c.bf16 %v524_v48, %v522_v47 }
 0x1e6   : > { %740 = vmatprep.subr.msk.bf16.mxu1 %vm739_vm4, %v738_v50 }
 0x1e7   : > { %743 = vmatpush1.bf16.msk.msra.mxu1 %vm739_vm4, %v741_v49 }
 0x1ea   : > { %723 = vmatmul.mubr.msk.f32.vlgmr.msra.gmra.mrb[4].mxu1 %vm532_vm5, %v525_v51 }
 0x2bd   : > { %v608_v53 = vpop.f32.mrb[4].mxu1 }
 0x2be   : > { %v609_v54 = vadd.f32 %v608_v53, %v530_v52  ;;  %v610_v55 = vpop.f32.mrb[5].mxu1 }
 0x2bf   : > { %v611_v56 = vadd.f32 %v610_v55, %v530_v52 }
 0x2c0   : > { %613 = vst [vmem:[%s296_s17] sm:$0xff] %v609_v54 }
 0x2c1   : > { %614 = vst [vmem:[%s296_s17 + $0x8] sm:$0xff] %v611_v56 }
 0x2c2   : > { %818 = shalt.err (!%p815_p5)
}
 0x2c3   : > { %s819_s10 = scalar_lea.hbm %s1027_s21, 256  ;;  %s823_s16 = scalar_lea.hbm %s1081_s7, 512 }
 0x2c4   : > { %p820_p6 = scmp.ne.s32.totalorder %s1027_s21, %s819_s10  ;;  %p824_p10 = scmp.lt.u32.totalorder %s1027_s21, %s1081_s7 }
 0x2c5   : > { %p825_p11 = scmp.lt.u32.totalorder %s823_s16, %s819_s10  ;;  %p827_p13 = scmp.lt.u32.totalorder %s819_s10, %s1027_s21 }
 0x2c6   : > { %p821_p7 = pnand %p820_p6, %p969_p4 }
 0x2c7   : > { %p826_p12 = por %p825_p11, %p824_p10 }
 0x2c8   : > { %p822_p9 = pneg %p821_p7 }
 0x2c9   : > { %p828_p0 = por %p827_p13, %p826_p12 }
 0x2cb   : > { %p829_p1 = pnand %p828_p0, %p822_p9 }
 0x2cd   : > { %832 = shalt.err (!%p829_p1)
}
 0x2ce   : > { %745 = dma.vmem_to_hbm [thread:$0]  (%p969_p4), %s1029_s18, 256, %s1027_s21, %s616_s27  }
 0x2cf PF: > { %p751_p2 = scmp.ge.s32.totalorder %s883_s29, 2  ;;  %s644_s20 = sand.u32 1, %s863_s24  }
 0x2d0   : > { %s645_s22 = scalar_lea.sflag [#allocation3], %s644_s20 }
 0x2d1   : > { %p748_p3 = pnand %p751_p2, %p976_p8 }
 0x2d3   : > { %858 = dma.done.wait (!%p748_p3), %s645_s22, 256  }
 0x2d4   : > { %860 = vsyncadd (!%p748_p3), %s645_s22, 4294967040  ;;  %s20_s29 = sadd.s32 1, %s883_s29   ;;  %s1084_s24 = smov %s867_s25 }
 0x2d5   : > { %p17_p5 = scmp.ge.s32.totalorder %s20_s29, 4   ;;  %s1085_s25 = smov %s871_s26 }
 0x2d6   : > { %s1086_s26 = smov %s982_s14  ;;  %s1087_s27 = smov %s879_s28 }
 0x2d7   : > { %s1088_s28 = smov %s1090_s9  ;;  %19 = sbr.rel (!%p17_p5) target bundleno = 4 (0x4), region = 83 }
 0x2de   :  { %650 = vsyncpa [#allocation3], 1 }
 0x2df   :  { %652 = vsyncpa [#allocation3 + $0x1], 1 }

</bundles_post_ra>
